<compile_context>
chip_gen: v7x
topology: tpu7x:2x2x1
jax: 0.10.0
libtpu: 0.0.40
codegen_flags: <defaults>
</compile_context>

<pallas_src>
import jax
import jax.numpy as jnp
from jax import lax
from jax.experimental import pallas as pl
from jax.experimental.pallas import tpu as pltpu


def _round_up(x, m):
    return ((x + m - 1) // m) * m


# ----------------------------------------------------------------------------
# Kernel 1: 3x3x3 "same" conv as one MXU contraction per (batch, D-tile) grid
#           step, fused with the per-step BatchNorm partial statistics.
# ----------------------------------------------------------------------------
def conv1_kernel(x_ref, w_ref, b_ref, y_ref, st_ref):
    # x_ref : (1, Dt, HW, Kpad)   bf16 im2col patches (lane-dense, K padded)
    # w_ref : (Kpad, ChPad)       bf16 conv1 weight, taps flattened (dz,dy,dx,cin)
    # b_ref : (1, ChPad)          f32
    # y_ref : (1, Dt, HW, ChPad)  bf16 pre-BN conv output (lane-dense)
    # st_ref: (1, 8, ChPad)       f32 per-step stats: row0 = sum, row1 = sumsq
    _, dt, hw, kp = x_ref.shape
    chp = w_ref.shape[1]
    patch = x_ref[...].reshape(dt * hw, kp)          # free: merges leading dims
    out = jnp.dot(patch, w_ref[...], preferred_element_type=jnp.float32)
    out = out + b_ref[...]
    # lane-dense unmasked store of the whole D-tile
    y_ref[...] = out.astype(y_ref.dtype).reshape(1, dt, hw, chp)
    # per-channel partial stats in f32 (computed on the f32 accumulator)
    s = jnp.sum(out, axis=0, keepdims=True)          # (1, ChPad)
    sq = jnp.sum(out * out, axis=0, keepdims=True)   # (1, ChPad)
    st_ref[0, 0:1, :] = s
    st_ref[0, 1:2, :] = sq
    st_ref[0, 2:8, :] = jnp.zeros((6, chp), jnp.float32)


def conv3x3x3_with_stats(x_ndhwc, w_dhwio, bias, *, d_tile=None,
                         vmem_limit=48 * 1024 * 1024):
    # x_ndhwc: (B, D, H, W, Cin), w_dhwio: (3, 3, 3, Cin, Ch), bias: (Ch,)
    B, D, H, W, Cin = x_ndhwc.shape
    Ch = w_dhwio.shape[-1]
    HW = H * W
    K = 27 * Cin
    Kpad = _round_up(K, 128)
    ChPad = _round_up(Ch, 128)

    if d_tile is None:
        # largest divisor of D whose bf16 patch+y blocks stay under ~4 MiB
        budget = 4 * 1024 * 1024
        d_tile = 1
        for dt in range(1, D + 1):
            if D % dt == 0 and dt * HW * (Kpad + ChPad) * 2 <= budget:
                d_tile = dt
    assert D % d_tile == 0  # TODO(synk): mask partial D tiles for non-divisor Dt
    n_dt = D // d_tile

    # ---- wrapper-side layout plumbing (lane-dense bf16 im2col) ----
    xb = x_ndhwc.astype(jnp.bfloat16)
    xp = jnp.pad(xb, ((0, 0), (1, 1), (1, 1), (1, 1), (0, 0)))
    cols = []
    for dz in range(3):
        for dy in range(3):
            for dx in range(3):
                cols.append(xp[:, dz:dz + D, dy:dy + H, dx:dx + W, :])
    patches = jnp.concatenate(cols, axis=-1).reshape(B, D, HW, K)
    patches = jnp.pad(patches, ((0, 0), (0, 0), (0, 0), (0, Kpad - K)))

    wf = jnp.pad(w_dhwio.reshape(K, Ch).astype(jnp.bfloat16),
                 ((0, Kpad - K), (0, ChPad - Ch)))
    bf = jnp.pad(bias.astype(jnp.float32).reshape(1, Ch),
                 ((0, 0), (0, ChPad - Ch)))

    y, stats = pl.pallas_call(
        conv1_kernel,
        out_shape=(jax.ShapeDtypeStruct((B, D, HW, ChPad), jnp.bfloat16),
                   jax.ShapeDtypeStruct((B * n_dt, 8, ChPad), jnp.float32)),
        grid=(B, n_dt),
        in_specs=[
            pl.BlockSpec((1, d_tile, HW, Kpad), lambda b, d: (b, d, 0, 0)),
            pl.BlockSpec((Kpad, ChPad), lambda b, d: (0, 0)),
            pl.BlockSpec((1, ChPad), lambda b, d: (0, 0)),
        ],
        out_specs=(
            pl.BlockSpec((1, d_tile, HW, ChPad), lambda b, d: (b, d, 0, 0)),
            pl.BlockSpec((1, 8, ChPad), lambda b, d: (b * n_dt + d, 0, 0)),
        ),
        compiler_params=pltpu.CompilerParams(
            # per-step partial stats -> no grid-resident accumulator ->
            # both axes independent (megacore-parallel on v7x)
            dimension_semantics=("parallel", "parallel"),
            vmem_limit_bytes=vmem_limit),
    )(patches, wf, bf)
    return y, stats


# ----------------------------------------------------------------------------
# Kernel 2: fused BatchNorm-apply + ReLU + 1x1x1 conv (pointwise matmul),
#           lane-dense bf16 input / lane-dense f32 output.
# ----------------------------------------------------------------------------
def bn_relu_conv1x1_kernel(x_ref, ss_ref, w_ref, b_ref, o_ref):
    # x_ref : (tile, ChPad)   bf16 conv1 output rows
    # ss_ref: (2, ChPad)      f32: row0 = scale, row1 = shift (folded BN affine)
    # w_ref : (ChPad, CfPad)  bf16 1x1x1 conv weight (zero-padded)
    # b_ref : (1, CfPad)      f32
    # o_ref : (tile, CfPad)   f32
    x = x_ref[...].astype(jnp.float32)
    scale = ss_ref[0:1, :]
    shift = ss_ref[1:2, :]
    z = jnp.maximum(x * scale + shift, 0.0).astype(jnp.bfloat16)
    o_ref[...] = (jnp.dot(z, w_ref[...], preferred_element_type=jnp.float32)
                  + b_ref[...])


def bn_relu_conv1x1(y2d, scale_pad, shift_pad, w, bias, *, row_tile=4096,
                    vmem_limit=48 * 1024 * 1024):
    # y2d: (N, ChPad) bf16; scale/shift: (ChPad,); w: (Ch, Cf); bias: (Cf,)
    N, ChPad = y2d.shape
    Ch, Cf = w.shape
    CfPad = _round_up(Cf, 128)
    wp = jnp.pad(w.astype(jnp.bfloat16), ((0, ChPad - Ch), (0, CfPad - Cf)))
    bp = jnp.pad(bias.astype(jnp.float32).reshape(1, Cf),
                 ((0, 0), (0, CfPad - Cf)))
    ss = jnp.stack([scale_pad, shift_pad], axis=0).astype(jnp.float32)

    if N <= row_tile:
        row_tile = max(8, _round_up(N, 8))
    n_tiles = pl.cdiv(N, row_tile)
    n_pad = n_tiles * row_tile
    if n_pad != N:
        y2d = jnp.pad(y2d, ((0, n_pad - N), (0, 0)))

    out = pl.pallas_call(
        bn_relu_conv1x1_kernel,
        out_shape=jax.ShapeDtypeStruct((n_pad, CfPad), jnp.float32),
        grid=(n_tiles,),
        in_specs=[
            pl.BlockSpec((row_tile, ChPad), lambda i: (i, 0)),
            pl.BlockSpec((2, ChPad), lambda i: (0, 0)),
            pl.BlockSpec((ChPad, CfPad), lambda i: (0, 0)),
            pl.BlockSpec((1, CfPad), lambda i: (0, 0)),
        ],
        out_specs=pl.BlockSpec((row_tile, CfPad), lambda i: (i, 0)),
        compiler_params=pltpu.CompilerParams(
            dimension_semantics=("parallel",),
            vmem_limit_bytes=vmem_limit),
    )(y2d, ss, wp, bp)
    return out[:N, :Cf]


# ----------------------------------------------------------------------------
# Full forward (num_layers = 2).
# ----------------------------------------------------------------------------
def volume_cnn_head_forward(x_ncdhw, params, eps=1e-5, d_tile=None):
    # x_ncdhw: (B, Cin, D, H, W) -> (B, final_dim, D, H, W)
    # TODO(synk): num_layers=3/4 variants repeat conv3x3x3_with_stats + BN/ReLU
    #             blocks before the final 1x1x1 conv; only num_layers=2 is wired.
    B, Cin, D, H, W = x_ncdhw.shape
    Ch = params["w1"].shape[-1]
    Cf = params["w2"].shape[-1]

    x = jnp.transpose(x_ncdhw, (0, 2, 3, 4, 1)).astype(jnp.float32)   # NDHWC
    y, stats = conv3x3x3_with_stats(x, params["w1"], params["b1"], d_tile=d_tile)

    ChPad = y.shape[-1]
    n_vox = B * D * H * W
    sums = jnp.sum(stats[:, 0, :Ch], axis=0)
    sqs = jnp.sum(stats[:, 1, :Ch], axis=0)
    mean = sums / n_vox
    # biased (training-mode BN) variance; f32, small mean -> no cancellation risk here
    var = jnp.maximum(sqs / n_vox - mean * mean, 0.0)
    scale = params["gamma"] / jnp.sqrt(var + eps)
    shift = params["beta"] - mean * scale
    scale_pad = jnp.pad(scale, (0, ChPad - Ch))
    shift_pad = jnp.pad(shift, (0, ChPad - Ch))

    y2d = y.reshape(n_vox, ChPad)                     # true no-op view
    outf = bn_relu_conv1x1(y2d, scale_pad, shift_pad, params["w2"], params["b2"])
    out = outf.reshape(B, D, H, W, Cf)
    # TODO(synk): consumers that accept NDHWC can skip this full-HBM transpose.
    return jnp.transpose(out, (0, 4, 1, 2, 3))        # NCDHW


# ----------------------------------------------------------------------------
# Pure-JAX f32 reference (same math, lax.conv) for validation.
# ----------------------------------------------------------------------------
def reference_forward(x_ncdhw, params, eps=1e-5):
    x = jnp.transpose(x_ncdhw, (0, 2, 3, 4, 1)).astype(jnp.float32)
    y = lax.conv_general_dilated(
        x, params["w1"], window_strides=(1, 1, 1), padding="SAME",
        dimension_numbers=("NDHWC", "DHWIO", "NDHWC")) + params["b1"]
    mean = jnp.mean(y, axis=(0, 1, 2, 3))
    var = jnp.var(y, axis=(0, 1, 2, 3))
    z = (y - mean) / jnp.sqrt(var + eps) * params["gamma"] + params["beta"]
    z = jnp.maximum(z, 0.0)
    out = jnp.einsum("bdhwc,cf->bdhwf", z, params["w2"]) + params["b2"]
    return jnp.transpose(out, (0, 4, 1, 2, 3))


def make_params(key, input_dim, hidden_dim, final_dim):
    k1, k2, k3, k4 = jax.random.split(key, 4)
    fan_in1 = input_dim * 27
    w1 = jax.random.uniform(k1, (3, 3, 3, input_dim, hidden_dim),
                            jnp.float32, -1.0, 1.0) / jnp.sqrt(fan_in1)
    b1 = jax.random.uniform(k2, (hidden_dim,), jnp.float32,
                            -1.0, 1.0) / jnp.sqrt(fan_in1)
    fan_in2 = hidden_dim
    w2 = jax.random.uniform(k3, (hidden_dim, final_dim),
                            jnp.float32, -1.0, 1.0) / jnp.sqrt(fan_in2)
    b2 = jax.random.uniform(k4, (final_dim,), jnp.float32,
                            -1.0, 1.0) / jnp.sqrt(fan_in2)
    gamma = jnp.ones((hidden_dim,), jnp.float32)   # BatchNorm3d default init
    beta = jnp.zeros((hidden_dim,), jnp.float32)
    return dict(w1=w1, b1=b1, w2=w2, b2=b2, gamma=gamma, beta=beta)


if __name__ == "__main__":
    B, Cin, D, H, W = 2, 4, 8, 8, 8
    hidden_dim, final_dim = 32, 8

    key = jax.random.PRNGKey(0)
    kx, kp = jax.random.split(key)
    x = jax.random.normal(kx, (B, Cin, D, H, W), jnp.float32)   # NCDHW input
    params = make_params(kp, Cin, hidden_dim, final_dim)

    # d_tile=4 exercises the multi-D-tile grid and the partial-stats reduction.
    out = jax.block_until_ready(volume_cnn_head_forward(x, params, d_tile=4))
    ref = jax.block_until_ready(reference_forward(x, params))

    assert out.shape == (B, final_dim, D, H, W), out.shape
    max_err = float(jnp.max(jnp.abs(out - ref)))
    # bf16 MXU operands / bf16 intermediate vs f32 reference -> 2e-2 tolerance
    assert jnp.allclose(out, ref, rtol=2e-2, atol=2e-2), f"max_err={max_err}"
    print("KERNEL_OK")
</pallas_src>

<mosaic_0001>
module attributes {stable_mosaic.version = 11 : i64} {
  func.func @conv1_kernel(%arg0: i32, %arg1: i32, %arg2: memref<1x4x64x128xbf16, #tpu.memory_space<vmem>>, %arg3: memref<128x128xbf16, #tpu.memory_space<vmem>>, %arg4: memref<1x128xf32, #tpu.memory_space<vmem>>, %arg5: memref<1x4x64x128xbf16, #tpu.memory_space<vmem>>, %arg6: memref<1x8x128xf32, #tpu.memory_space<vmem>>) attributes {dimension_semantics = [#tpu.dimension_semantics<parallel>, #tpu.dimension_semantics<parallel>], iteration_bounds = array<i64: 2, 2>, scalar_prefetch = 0 : i64, scratch_operands = 0 : i64, tpu.core_type = #tpu.core_type<tc>, window_params = [{transform_indices = @transform_0, window_bounds = array<i64: 1, 4, 64, 128>}, {pipeline_mode = #tpu.pipeline_mode<synchronous>, transform_indices = @transform_1, window_bounds = array<i64: 128, 128>}, {pipeline_mode = #tpu.pipeline_mode<synchronous>, transform_indices = @transform_2, window_bounds = array<i64: 1, 128>}, {transform_indices = @transform_3, window_bounds = array<i64: 1, 4, 64, 128>}, {transform_indices = @transform_4, window_bounds = array<i64: 1, 8, 128>}]} {
    %c0 = arith.constant 0 : index
    %c0_0 = arith.constant 0 : index
    %c0_1 = arith.constant 0 : index
    %c0_2 = arith.constant 0 : index
    %0 = vector.load %arg2[%c0, %c0_0, %c0_1, %c0_2] : memref<1x4x64x128xbf16, #tpu.memory_space<vmem>>, vector<1x4x64x128xbf16>
    %1 = vector.shape_cast %0 : vector<1x4x64x128xbf16> to vector<256x128xbf16>
    %c0_3 = arith.constant 0 : index
    %c0_4 = arith.constant 0 : index
    %2 = vector.load %arg3[%c0_3, %c0_4] : memref<128x128xbf16, #tpu.memory_space<vmem>>, vector<128x128xbf16>
    %cst = arith.constant dense<0.000000e+00> : vector<256x128xf32>
    %3 = tpu.matmul %1, %2, %cst {dimension_numbers = #tpu.dot_dimension_numbers<[1], [0], [0], [1], [0, 0, 1, 1], [], []>} : vector<256x128xbf16>, vector<128x128xbf16>, vector<256x128xf32> -> vector<256x128xf32>
    %c0_5 = arith.constant 0 : index
    %c0_6 = arith.constant 0 : index
    %4 = vector.load %arg4[%c0_5, %c0_6] : memref<1x128xf32, #tpu.memory_space<vmem>>, vector<1x128xf32>
    %5 = vector.broadcast %4 : vector<1x128xf32> to vector<256x128xf32>
    %6 = arith.addf %3, %5 : vector<256x128xf32>
    %7 = arith.truncf %6 : vector<256x128xf32> to vector<256x128xbf16>
    %8 = vector.shape_cast %7 : vector<256x128xbf16> to vector<1x4x64x128xbf16>
    %c0_7 = arith.constant 0 : index
    %c0_8 = arith.constant 0 : index
    %c0_9 = arith.constant 0 : index
    %c0_10 = arith.constant 0 : index
    %9 = vector.load %arg5[%c0_7, %c0_8, %c0_9, %c0_10] : memref<1x4x64x128xbf16, #tpu.memory_space<vmem>>, vector<1x4x64x128xbf16>
    tpu.vector_store %arg5[%c0_7, %c0_8, %c0_9, %c0_10], %8 {strides = array<i32>} : memref<1x4x64x128xbf16, #tpu.memory_space<vmem>>, vector<1x4x64x128xbf16>,
    %cst_11 = arith.constant dense<0.000000e+00> : vector<128xf32>
    %10 = vector.multi_reduction <add>, %6, %cst_11 [0] : vector<256x128xf32> to vector<128xf32>
    %11 = vector.shape_cast %10 : vector<128xf32> to vector<1x128xf32>
    %12 = arith.mulf %6, %6 : vector<256x128xf32>
    %cst_12 = arith.constant dense<0.000000e+00> : vector<128xf32>
    %13 = vector.multi_reduction <add>, %12, %cst_12 [0] : vector<256x128xf32> to vector<128xf32>
    %14 = vector.shape_cast %13 : vector<128xf32> to vector<1x128xf32>
    %c0_13 = arith.constant 0 : index
    %c0_14 = arith.constant 0 : index
    %c0_15 = arith.constant 0 : index
    %15 = vector.load %arg6[%c0_13, %c0_14, %c0_15] : memref<1x8x128xf32, #tpu.memory_space<vmem>>, vector<1x1x128xf32>
    %16 = vector.shape_cast %15 : vector<1x1x128xf32> to vector<1x128xf32>
    %17 = vector.shape_cast %11 : vector<1x128xf32> to vector<1x1x128xf32>
    tpu.vector_store %arg6[%c0_13, %c0_14, %c0_15], %17 {strides = array<i32>} : memref<1x8x128xf32, #tpu.memory_space<vmem>>, vector<1x1x128xf32>,
    %c0_16 = arith.constant 0 : index
    %c1 = arith.constant 1 : index
    %c0_17 = arith.constant 0 : index
    %18 = vector.load %arg6[%c0_16, %c1, %c0_17] : memref<1x8x128xf32, #tpu.memory_space<vmem>>, vector<1x1x128xf32>
    %19 = vector.shape_cast %18 : vector<1x1x128xf32> to vector<1x128xf32>
    %20 = vector.shape_cast %14 : vector<1x128xf32> to vector<1x1x128xf32>
    tpu.vector_store %arg6[%c0_16, %c1, %c0_17], %20 {strides = array<i32>} : memref<1x8x128xf32, #tpu.memory_space<vmem>>, vector<1x1x128xf32>,
    %cst_18 = arith.constant 0.000000e+00 : f32
    %21 = vector.broadcast %cst_18 : f32 to vector<6x128xf32>
    %c0_19 = arith.constant 0 : index
    %c2 = arith.constant 2 : index
    %c0_20 = arith.constant 0 : index
    %22 = vector.load %arg6[%c0_19, %c2, %c0_20] : memref<1x8x128xf32, #tpu.memory_space<vmem>>, vector<1x6x128xf32>
    %23 = vector.shape_cast %22 : vector<1x6x128xf32> to vector<6x128xf32>
    %24 = vector.shape_cast %21 : vector<6x128xf32> to vector<1x6x128xf32>
    tpu.vector_store %arg6[%c0_19, %c2, %c0_20], %24 {strides = array<i32>} : memref<1x8x128xf32, #tpu.memory_space<vmem>>, vector<1x6x128xf32>,
    return
  }
  func.func @transform_0(%arg0: i32, %arg1: i32) -> (i32, i32, i32, i32) {
    %c0_i32 = arith.constant 0 : i32
    %c0_i32_0 = arith.constant 0 : i32
    %c0_i32_1 = arith.constant 0 : i32
    return %arg0, %arg1, %c0_i32, %c0_i32_0 : i32, i32, i32, i32
  }
  func.func @transform_1(%arg0: i32, %arg1: i32) -> (i32, i32) {
    %c0_i32 = arith.constant 0 : i32
    %c0_i32_0 = arith.constant 0 : i32
    %c0_i32_1 = arith.constant 0 : i32
    return %c0_i32, %c0_i32_0 : i32, i32
  }
  func.func @transform_2(%arg0: i32, %arg1: i32) -> (i32, i32) {
    %c0_i32 = arith.constant 0 : i32
    %c0_i32_0 = arith.constant 0 : i32
    %c0_i32_1 = arith.constant 0 : i32
    return %c0_i32, %c0_i32_0 : i32, i32
  }
  func.func @transform_3(%arg0: i32, %arg1: i32) -> (i32, i32, i32, i32) {
    %c0_i32 = arith.constant 0 : i32
    %c0_i32_0 = arith.constant 0 : i32
    %c0_i32_1 = arith.constant 0 : i32
    return %arg0, %arg1, %c0_i32, %c0_i32_0 : i32, i32, i32, i32
  }
  func.func @transform_4(%arg0: i32, %arg1: i32) -> (i32, i32, i32) {
    %c2_i32 = arith.constant 2 : i32
    %0 = arith.muli %arg0, %c2_i32 : i32
    %1 = arith.addi %0, %arg1 : i32
    %c0_i32 = arith.constant 0 : i32
    %c0_i32_0 = arith.constant 0 : i32
    %c0_i32_1 = arith.constant 0 : i32
    return %1, %c0_i32, %c0_i32_0 : i32, i32, i32
  }
}

</mosaic_0001>

<bundles_post_ra>
// kernel: tpu_custom_call.1
= control target key start
LH: loop header
LB: loop body
LE: loop exit
PB: predicated region body
PF: predicated region fallthrough
CT: control target
= control target key end

     0   :  { %s2285_s0 = inlined_call_operand.hbm [shape: bf16[2,8,64,128], index: 0, kind: input, shape index: {}]   ;;  %s2286_s1 = inlined_call_operand.hbm [shape: bf16[128,128], index: 1, kind: input, shape index: {}]   ;;  %s2287_s2 = inlined_call_operand.vmem [shape: f32[1,128], index: 2, kind: input, shape index: {}]   ;;  %s2288_s3 = inlined_call_operand.hbm [shape: bf16[2,8,64,128], index: 3, kind: output, shape index: {0}]   ;;  %s2289_s4 = inlined_call_operand.hbm [shape: f32[4,8,128], index: 4, kind: output, shape index: {1}]  }
   0x1   :  { %2314 = sst [smem:[#allocation24_spill]] %s2286_s1 }
   0x2   :  { %2315 = sst [smem:[#allocation25_spill]] %s2287_s2 }
   0x3   :  { %2316 = sst [smem:[#allocation26_spill]] %s2288_s3 }
   0x4   :  { %2317 = sst [smem:[#allocation27_spill]] %s2289_s4 }
   0x5   :  { %10 = vsyncpa [#allocation3], 0 }
   0x6   :  { %12 = vsyncpa [#allocation3 + $0x1], 0 }
   0x7   :  { %13 = vsyncpa [#allocation6], 0 }
   0x8   :  { %14 = vsyncpa [#allocation4], 0 }
   0x9   :  { %16 = vsyncpa [#allocation4 + $0x1], 0 }
   0xa   :  { %17 = vsyncpa [#allocation9], 0 }
   0xb   :  { %19 = vsyncpa [#allocation9 + $0x1], 0  ;;  %s1770_s15 = smov 0   ;;  %s1772_s16 = smov 0  }
   0xc   :  { %s1774_s17 = smov 0   ;;  %s1776_s18 = smov 0  }
   0xd   :  { %s1778_s19 = smov 0   ;;  %s1780_s20 = smov 0  }
   0xe   :  { %s1782_s21 = smov 0   ;;  %s1784_s22 = smov 0  }
   0xf   :  { %s1786_s23 = smov 0   ;;  %s1788_s24 = smov 0  }
  0x10   :  { %s1790_s25 = smov 0  }
  0x11 LB: > { %2318 = sst [smem:[#allocation14_spill]] %s1694_s15  ;;  %s1070_s26 = sadd.s32 4294967295, %s1734_s25   ;;  %s1734_s25 = sphi %s1790_s25, %s25_s25   ;;  %s1730_s24 = sphi %s1788_s24, %s2374_s24   ;;  %s1726_s23 = sphi %s1786_s23, %s2373_s23   ;;  %s1722_s22 = sphi %s1784_s22, %s2372_s22   ;;  %s1718_s21 = sphi %s1782_s21, %s2371_s21   ;;  %s1714_s20 = sphi %s1780_s20, %s2370_s20   ;;  %s1710_s19 = sphi %s1778_s19, %s2369_s19   ;;  %s1706_s18 = sphi %s1776_s18, %s2368_s18   ;;  %s1702_s17 = sphi %s1774_s17, %s2367_s17   ;;  %s1698_s16 = sphi %s1772_s16, %s2366_s16   ;;  %s1694_s15 = sphi %s1770_s15, %s2365_s15  }
  0x12   : > { %2319 = sst [smem:[#allocation15_spill]] %s1698_s16  ;;  %s1071_s27 = sadd.s32 4294967294, %s1734_s25  }
  0x13   : > { %2320 = sst [smem:[#allocation16_spill]] %s1706_s18  ;;  %p59_p0 = scmp.ne.s32.totalorder %s1710_s19, %s1706_s18 }
  0x14   : > { %2321 = sst [smem:[#allocation17_spill]] %s1718_s21  ;;  %p1829_p1 = scmp.eq.s32.totalorder %s1070_s26, 0 }
  0x15   : > { %2322 = sst [smem:[#allocation18_spill]] %s1722_s22  ;;  %p1833_p2 = scmp.eq.s32.totalorder %s1070_s26, 3 }
  0x16   : > { %s2323_s28 = scalar_select %p1829_p1, 1, 0 }
  0x17   : > { %s2325_s29 = scalar_select %p1833_p2, 1, 0 }
  0x18   : > { %2324 = sst [smem:[#allocation19_spill]] %s2323_s28  ;;  %p133_p3 = scmp.eq.s32.totalorder %s1071_s27, 3 }
  0x19   : > { %p1839_p4 = por %p1829_p1, %p59_p0  ;;  %p156_p6 = scmp.ne.s32.totalorder %s1702_s17, %s1698_s16 }
  0x1a   : > { %p1844_p5 = por %p133_p3, %p59_p0  ;;  %p162_p7 = scmp.ne.s32.totalorder %s1698_s16, %s1694_s15 }
  0x1b   : > { %s2326_s30 = scalar_select %p1839_p4, 1, 0 }
  0x1c   : > { %s2327_s6 = scalar_select %p1844_p5, 1, 0 }
  0x1d   : > { %p1074_p8 = scmp.ge.s32.totalorder %s1734_s25, 1  ;;  %p1855_p9 = por %p156_p6, %p1833_p2 }
  0x1e   : > { %2328 = sst [smem:[#allocation20_spill]] %s2327_s6  ;;  %p170_p10 = scmp.lt.s32.totalorder %s1734_s25, 5 }
  0x1f   : > { %s2329_s7 = scalar_select %p1855_p9, 1, 0 }
  0x20   : > { %p1860_p11 = por %p162_p7, %p133_p3  ;;  %p1864_p12 = pnand %p1074_p8, %p170_p10 }
  0x21   : > { %2330 = sst [smem:[#allocation21_spill]] %s2329_s7  ;;  %s1736_s10 = smov [#allocation5]  }
  0x22   : > { %s2331_s8 = scalar_select %p1860_p11, 1, 0 }
  0x23   : > { %s2333_s9 = scalar_select %p1864_p12, 1, 0 }
  0x24   : > { %2332 = sst [smem:[#allocation22_spill]] %s2331_s8  ;;  %s182_s11 = sshll.u32 %s1736_s10, 4  ;;  %s183_s11 = int_to_ptr.vmem [resolvable:$true] %s182_s11 }
  0x25   : > { %p1381_p13 = pneg %p1864_p12  ;;  %s2335_s1 = sld [smem:[#allocation24_spill]] }
  0x27   : > { %p1872_p0 = pnand %p1381_p13, %p1829_p1 }
  0x29   : > { %p1520_p6 = pneg %p1872_p0 }
  0x2b   : > { %s1518_s26 = scalar_lea.hbm %s2335_s1, 1024 }
  0x2c   : > { %p1519_p3 = scmp.ne.s32.totalorder %s2335_s1, %s1518_s26  ;;  %p1525_p10 = scmp.lt.u32.totalorder %s1518_s26, %s2335_s1 }
  0x2e   : > { %p1521_p7 = pnand %p1520_p6, %p1519_p3 }
  0x30   : > { %p1522_p8 = pneg %p1521_p7 }
  0x32   : > { %p1527_p13 = pnand %p1525_p10, %p1522_p8 }
  0x34   : > { %1530 = shalt.err (!%p1527_p13)
}
  0x35   : > { %s1531_s15 = scalar_lea.vmem %s183_s11, 1024  ;;  %p1539_p1 = scmp.lt.s32.totalorder %s183_s11, %s183_s11 }
  0x36   : > { %p1532_p11 = scmp.ne.s32.totalorder %s183_s11, %s1531_s15  ;;  %p1540_p4 = scmp.lt.s32.totalorder %s1531_s15, %s1531_s15 }
  0x38   : > { %p1534_p5 = pnand %p1532_p11, %p1520_p6  ;;  %p1541_p12 = por %p1540_p4, %p1539_p1 }
  0x3a   : > { %p1535_p9 = pneg %p1534_p5 }
  0x3c   : > { %p1542_p2 = pnand %p1541_p12, %p1535_p9 }
  0x3e   : > { %1545 = shalt.err (!%p1542_p2)
}
  0x3f   : > { %s2298_s5 = smov 64   ;;  %s2299_s8 = smov 4  }
  0x40   : > { %1384 = dma.hbm_to_vmem [thread:$0]  (!%p1872_p0), %s2335_s1, 1024, %s183_s11, [#allocation6], %s2298_s5, %s2298_s5, %s2299_s8  }
  0x41   : > { %s34_s14 = sadd.s32 1, %s1726_s23  ;;  %s37_s26 = sadd.s32 1, %s1730_s24 }
  0x42   : > { %p35_p1 = scmp.ge.s32.totalorder %s34_s14, 2  ;;  %s46_s27 = sadd.s32 1, %s1714_s20 }
  0x43   : > { %p53_p2 = scmp.ne.s32.totalorder %s1714_s20, %s1710_s19  ;;  %p54_p4 = scmp.eq.s32.totalorder %s1734_s25, 0 }
  0x44   : > { %s2376_s14 = smov (%p35_p1, %s34_s14), 0  ;;  %s2378_s26 = smov (!%p35_p1, %s37_s26), %s1730_s24 }
  0x45   : > { %s42_s12 = ssub.s32 %s1726_s23, %s2376_s14  ;;  %p1906_p5 = por %p54_p4, %p53_p2 }
  0x46   : > { %p39_p9 = scmp.ge.s32.totalorder %s2378_s26, 2  ;;  %p2337_p11 = scmp.ne.s32.totalorder %s2325_s29, 0 }
  0x47   : > { %s1072_s15 = sshll.u32 %s1730_s24, 1  ;;  %p1397_p0 = scmp.lt.s32.totalorder %s1734_s25, 4 }
  0x48   : > { %p1912_p12 = por %p2337_p11, %p53_p2  ;;  %s2380_s26 = smov (%p39_p9, %s2378_s26), 0 }
  0x49   : > { %s140_s13 = sadd.s32 %s1726_s23, %s1072_s15  ;;  %s199_s5 = sand.u32 1, %s1714_s20  }
  0x4a   : > { %s2338_s11 = scalar_select %p1912_p12, 1, 0 }
  0x4b   : > { %s41_s8 = ssub.s32 %s1730_s24, %s2380_s26  ;;  %s1073_s1 = sshll.u32 %s2380_s26, 1 }
  0x4c   : > { %2339 = sst [smem:[#allocation23_spill]] %s2338_s11  ;;  %s43_s6 = sor.u32 %s42_s12, %s41_s8 }
  0x4d   : > { %s142_s29 = sadd.s32 %s1073_s1, %s2376_s14  ;;  %p44_p3 = scmp.eq.s32.totalorder %s43_s6, 0 }
  0x4e   : > { %s143_s18 = ssub.s32 %s140_s13, %s142_s29  ;;  %s2340_s7 = sadd.s32 1, %s1702_s17 }
  0x4f   : > { %p144_p6 = scmp.eq.s32.totalorder %s143_s18, 0  ;;  %s1077_s11 = sshll.u32 %s199_s5, 7 }
  0x50   : > { %s1927_s4 = scalar_select %p44_p3, %s1714_s20, %s46_s27  }
  0x51   : > { %s1932_s3 = scalar_select %p144_p6, %s1702_s17, %s2340_s7  }
  0x52   : > { %s1154_s22 = sshll.u32 %s1726_s23, 5  ;;  %s1080_s21 = sshll.u32 %s1730_s24, 6 }
  0x53   : > { %s210_s2 = sadd.s32 %s1154_s22, %s1080_s21  ;;  %s203_s15 = scalar_lea.vmem [#allocation2], %s1077_s11 }
  0x54   : > { %s213_s16 = sshll.u32 %s203_s15, 4  ;;  %s1081_s28 = sshll.u32 %s210_s2, 6  ;;  %s1936_s16 = int_to_ptr.vmem [resolvable:$true] %s213_s16 }
  0x55   : > { %s1941_s1 = scalar_lea.hbm %s2285_s0, %s1081_s28  ;;  %p1947_p7 = pnand %p1397_p0, %p1906_p5 }
  0x56   : > { %s1951_s2 = scalar_lea.sflag [#allocation3], %s199_s5  ;;  %s1546_s21 = scalar_lea.hbm %s1941_s1, 2048 }
  0x57   : > { %p1547_p8 = scmp.ne.s32.totalorder %s1941_s1, %s1546_s21  ;;  %p1548_p10 = pneg %p1947_p7 }
  0x58   : > { %s1551_s6 = scalar_lea.hbm %s2285_s0, 8192  ;;  %p1552_p2 = scmp.lt.u32.totalorder %s1941_s1, %s2285_s0 }
  0x59   : > { %p1549_p13 = pnand %p1548_p10, %p1547_p8  ;;  %p1553_p4 = scmp.lt.u32.totalorder %s1551_s6, %s1546_s21 }
  0x5a   : > { %p1555_p9 = scmp.lt.u32.totalorder %s1546_s21, %s1941_s1 }
  0x5b   : > { %p1550_p1 = pneg %p1549_p13  ;;  %p1554_p5 = por %p1553_p4, %p1552_p2 }
  0x5d   : > { %p1556_p11 = por %p1555_p9, %p1554_p5 }
  0x5f   : > { %p1557_p0 = pnand %p1556_p11, %p1550_p1 }
  0x61   : > { %1560 = shalt.err (!%p1557_p0)
}
  0x62   : > { %s1561_s5 = scalar_lea.vmem %s1936_s16, 2048  ;;  %s1739_s10 = smov [#allocation2]  }
  0x63   : > { %p1562_p3 = scmp.ne.s32.totalorder %s1936_s16, %s1561_s5  ;;  %s1566_s11 = sshll.u32 %s1739_s10, 4  ;;  %s1567_s11 = int_to_ptr.vmem [resolvable:$false] %s1566_s11 }
  0x64   : > { %s1568_s13 = scalar_lea.vmem %s1567_s11, 4096  ;;  %p1569_p13 = scmp.lt.s32.totalorder %s1936_s16, %s1567_s11 }
  0x65   : > { %p1564_p6 = pnand %p1562_p3, %p1548_p10  ;;  %p1570_p2 = scmp.lt.s32.totalorder %s1568_s13, %s1561_s5 }
  0x67   : > { %p1565_p8 = pneg %p1564_p6  ;;  %p1571_p4 = por %p1570_p2, %p1569_p13 }
  0x69   : > { %p1572_p5 = pnand %p1571_p4, %p1565_p8 }
  0x6b   : > { %1575 = shalt.err (!%p1572_p5)
}
  0x6c   : > { %s2342_s29 = smov 4   ;;  %s2343_s15 = smov 64  }
  0x6d   : > { %1388 = dma.hbm_to_vmem [thread:$0]  (!%p1947_p7), %s1941_s1, 2048, %s1936_s16, %s1951_s2, %s2343_s15, %s2343_s15, %s2342_s29  }
  0x6e   : > { %p2344_p10 = scmp.ne.s32.totalorder %s2333_s9, 0 }
  0x6f   : > { %s1985_s8 = sand.u32 (!%p2344_p10), 1, %s1710_s19   ;;  %p2345_p1 = scmp.ne.s32.totalorder (!%p2344_p10), %s2326_s30, 0 }
  0x70   : > { %225 = sbr.rel (%p2344_p10) target bundleno = 480 (0x1e0), region = 32  ;;  %s1083_s12 = sshll.u32 (!%p2344_p10), %s1985_s8, 7 }
  0x71   : > { %s228_s21 = scalar_lea.sflag (!%p2344_p10), [#allocation3], %s1985_s8  ;;  %s1991_s18 = scalar_lea.vmem (!%p2344_p10), [#allocation2], %s1083_s12 }
  0x77   : > { %1677 = dma.done.wait (%p2345_p1), %s228_s21, 2048  }
  0x78   : > { %1679 = vsyncadd (%p2345_p1), %s228_s21, 4294965248  ;;  %s2346_s16 = sld [smem:[#allocation19_spill]] }
  0x7e   : > { %p2347_p7 = scmp.ne.s32.totalorder %s2346_s16, 0 }
  0x80   : > { %1681 = dma.done.wait (%p2347_p7), [#allocation6], 1024  }
  0x81   : > { %1683 = vsyncadd (%p2347_p7), [#allocation6], 4294966272  ;;  %v1494_v0 = vld [vmem:[#allocation5] sm:$0xff]   ;;  %v1495_v1 = vld [vmem:[#allocation5 + $0x8] sm:$0xff]   ;;  %s2348_s30 = sld [smem:[#allocation15_spill]]  ;;  %v1740_v24 = vmov 0.0  }
  0x82   : > { %1307 = vmatprep.subr.bf16.mxu0 %v1494_v0  ;;  %1355 = vmatprep.subr.bf16.mxu1 %v1494_v0  ;;  %v1496_v2 = vld [vmem:[#allocation5 + $0x10] sm:$0xff]   ;;  %v1497_v3 = vld [vmem:[#allocation5 + $0x18] sm:$0xff]   ;;  %v1502_v4 = vld [vmem:[%s1991_s18] sm:$0xff]   ;;  %s2349_s6 = sld [smem:[#allocation25_spill]]  ;;  %s2050_s7 = scalar_lea.vmem [#allocation7], %s1083_s12 }
  0x83   : > { %1308 = vmatpush3.bf16.msra.mxu0 %v1494_v0  ;;  %1363 = vmatpush3.bf16.msra.mxu1 %v1494_v0  ;;  %v1498_v5 = vld [vmem:[#allocation5 + $0x20] sm:$0xff]   ;;  %v1499_v6 = vld [vmem:[#allocation5 + $0x28] sm:$0xff]   ;;  %v1500_v8 = vld [vmem:[#allocation5 + $0x30] sm:$0xff]   ;;  %s2350_s27 = sld [smem:[#allocation17_spill]]  ;;  %s2351_s5 = sld [smem:[#allocation18_spill]] }
  0x84   : > { %1309 = vmatprep.subr.bf16.mxu0 %v1495_v1  ;;  %1356 = vmatprep.subr.bf16.mxu1 %v1495_v1  ;;  %v1510_v7 = vld [vmem:[%s1991_s18 + $0x40] sm:$0xff]   ;;  %v1501_v9 = vld [vmem:[#allocation5 + $0x38] sm:$0xff]   ;;  %v1503_v10 = vld [vmem:[%s1991_s18 + $0x8] sm:$0xff]   ;;  %s921_s29 = sshll.u32 %s2050_s7, 4  ;;  %s2353_s16 = sld [smem:[#allocation26_spill]]  ;;  %s2128_s29 = int_to_ptr.vmem [resolvable:$true] %s921_s29 }
  0x85   : > { %1323 = vmatprep.mubr.bf16.mxu0 %v1502_v4  ;;  %1339 = vmatprep.mubr.bf16.mxu1 %v1510_v7  ;;  %v1511_v11 = vld [vmem:[%s1991_s18 + $0x48] sm:$0xff]   ;;  %v1504_v12 = vld [vmem:[%s1991_s18 + $0x10] sm:$0xff]   ;;  %v1505_v14 = vld [vmem:[%s1991_s18 + $0x18] sm:$0xff]   ;;  %s900_s28 = scalar_lea.sflag [#allocation4], %s1985_s8 }
  0x86   : > { %v1512_v13 = vld [vmem:[%s1991_s18 + $0x50] sm:$0xff]   ;;  %v1513_v15 = vld [vmem:[%s1991_s18 + $0x58] sm:$0xff]   ;;  %v1506_v16 = vld [vmem:[%s1991_s18 + $0x20] sm:$0xff]  }
  0x87   : > { %1310 = vmatpush3.bf16.msra.mxu0 %v1495_v1  ;;  %1364 = vmatpush3.bf16.msra.mxu1 %v1495_v1  ;;  %v1514_v17 = vld [vmem:[%s1991_s18 + $0x60] sm:$0xff]   ;;  %v1507_v18 = vld [vmem:[%s1991_s18 + $0x28] sm:$0xff]   ;;  %v1508_v20 = vld [vmem:[%s1991_s18 + $0x30] sm:$0xff]   ;;  %s262_s9 = sand.u32 1, %s2348_s30  }
  0x88   : > { %1311 = vmatprep.subr.bf16.mxu0 %v1496_v2  ;;  %1357 = vmatprep.subr.bf16.mxu1 %v1496_v2  ;;  %v1515_v19 = vld [vmem:[%s1991_s18 + $0x68] sm:$0xff]   ;;  %v1516_v21 = vld [vmem:[%s1991_s18 + $0x70] sm:$0xff]   ;;  %v1509_v22 = vld [vmem:[%s1991_s18 + $0x38] sm:$0xff]   ;;  %s1086_s1 = sshll.u32 %s262_s9, 3 }
  0x89   : > { %v1517_v23 = vld [vmem:[%s1991_s18 + $0x78] sm:$0xff]   ;;  %s2020_s2 = scalar_lea.vmem [#allocation8], %s1086_s1  ;;  %v2026_v25 = vld [vmem:[%s2349_s6] ss:$0 sm:$0xff]  ;;  %s1187_s10 = sshll.u32 %s2350_s27, 5 }
  0x8a   : > { %898 = vst [vmem:[%s2020_s2 + $0x2] sm:$0x3f] %v1740_v24  ;;  %s1148_s11 = sshll.u32 %s2351_s5, 6  ;;  %s2354_s1 = smov %s2353_s16 }
  0x8b   : > { %1312 = vmatpush3.bf16.msra.mxu0 %v1496_v2  ;;  %1365 = vmatpush3.bf16.msra.mxu1 %v1496_v2  ;;  %s918_s13 = sadd.s32 %s1187_s10, %s1148_s11  ;;  %s1576_s6 = scalar_lea.vmem %s2128_s29, 2048 }
  0x8c   : > { %1313 = vmatprep.subr.bf16.mxu0 %v1497_v3  ;;  %1358 = vmatprep.subr.bf16.mxu1 %v1497_v3  ;;  %s1149_s15 = sshll.u32 %s918_s13, 6  ;;  %p1577_p9 = scmp.ne.s32.totalorder %s2128_s29, %s1576_s6 }
  0x8d   : > { %s2135_s22 = scalar_lea.hbm %s2353_s16, %s1149_s15  ;;  %s1741_s10 = smov [#allocation7]  }
  0x8e   : > { %p1578_p11 = pnand %p1577_p9, %p1912_p12  ;;  %s1580_s11 = sshll.u32 %s1741_s10, 4  ;;  %s1581_s11 = int_to_ptr.vmem [resolvable:$false] %s1580_s11 }
  0x8f   : > { %1314 = vmatpush3.bf16.msra.mxu0 %v1497_v3  ;;  %1366 = vmatpush3.bf16.msra.mxu1 %v1497_v3  ;;  %s1582_s13 = scalar_lea.vmem %s1581_s11, 4096  ;;  %p1583_p3 = scmp.lt.s32.totalorder %s2128_s29, %s1581_s11 }
  0x90   : > { %1315 = vmatprep.subr.bf16.mxu0 %v1498_v5  ;;  %1359 = vmatprep.subr.bf16.mxu1 %v1498_v5  ;;  %p1579_p0 = pneg %p1578_p11  ;;  %p1584_p6 = scmp.lt.s32.totalorder %s1582_s13, %s1576_s6 }
  0x92   : > { %p1585_p8 = por %p1584_p6, %p1583_p3 }
  0x93   : > { %1316 = vmatpush3.bf16.msra.mxu0 %v1498_v5  ;;  %1367 = vmatpush3.bf16.msra.mxu1 %v1498_v5 }
  0x94   : > { %1317 = vmatprep.subr.bf16.mxu0 %v1499_v6  ;;  %1360 = vmatprep.subr.bf16.mxu1 %v1499_v6  ;;  %p1586_p13 = pnand %p1585_p8, %p1579_p0 }
  0x97   : > { %1318 = vmatpush3.bf16.msra.mxu0 %v1499_v6  ;;  %1368 = vmatpush3.bf16.msra.mxu1 %v1499_v6 }
  0x98   : > { %1319 = vmatprep.subr.bf16.mxu0 %v1500_v8  ;;  %1361 = vmatprep.subr.bf16.mxu1 %v1500_v8 }
  0x9b   : > { %1320 = vmatpush3.bf16.msra.mxu0 %v1500_v8  ;;  %1369 = vmatpush3.bf16.msra.mxu1 %v1500_v8 }
  0x9c   : > { %1321 = vmatprep.subr.bf16.mxu0 %v1501_v9  ;;  %1362 = vmatprep.subr.bf16.mxu1 %v1501_v9 }
  0x9f   : > { %1322 = vmatpush3.bf16.msra.mxu0 %v1501_v9  ;;  %1370 = vmatpush3.bf16.msra.mxu1 %v1501_v9 }
  0xa2   : > { %1324 = vmatmul.mubr.bf16.vlgmr.msra.gmra.mrb[0].mxu0 %v1503_v10  ;;  %1340 = vmatmul.mubr.bf16.vlgmr.msra.gmra.mrb[0].mxu1 %v1511_v11 }
  0xa3   : > { %1327 = vmatprep.mubr.bf16.mxu0 %v1504_v12  ;;  %1343 = vmatprep.mubr.bf16.mxu1 %v1512_v13 }
  0xaa   : > { %1328 = vmatmul.mubr.bf16.gmra.mrb[4].mxu0 %v1505_v14  ;;  %1344 = vmatmul.mubr.bf16.gmra.mrb[4].mxu1 %v1513_v15 }
  0xab   : > { %1331 = vmatprep.mubr.bf16.mxu0 %v1506_v16  ;;  %1347 = vmatprep.mubr.bf16.mxu1 %v1514_v17 }
  0xb2   : > { %1332 = vmatmul.mubr.bf16.gmra.mrb[8].mxu0 %v1507_v18  ;;  %1348 = vmatmul.mubr.bf16.gmra.mrb[8].mxu1 %v1515_v19 }
  0xb3   : > { %1335 = vmatprep.mubr.bf16.mxu0 %v1508_v20  ;;  %1351 = vmatprep.mubr.bf16.mxu1 %v1516_v21 }
  0xba   : > { %1336 = vmatmul.mubr.bf16.gmra.mrb[12].mxu0 %v1509_v22  ;;  %1352 = vmatmul.mubr.bf16.gmra.mrb[12].mxu1 %v1517_v23 }
 0x175   : > { %v1325_v26 = vpop.f32.mrb[0].mxu0  ;;  %v1341_v27 = vpop.f32.mrb[0].mxu1 }
 0x176   : > { %v503_v28 = vpop.f32.mrb[1].mxu0  ;;  %v2029_v29 = vadd.f32 %v1341_v27, %v2026_v25  ;;  %v567_v30 = vpop.f32.mrb[1].mxu1  ;;  %v512_v35 = vadd.f32 %v1325_v26, %v2026_v25 }
 0x177   : > { %v504_v31 = vadd.f32 %v2026_v25, %v503_v28  ;;  %v1326_v32 = vpop.f32.mrb[2].mxu0  ;;  %v2033_v33 = vadd.f32 %v2026_v25, %v567_v30  ;;  %v1342_v34 = vpop.f32.mrb[2].mxu1 }
 0x178   : > { %v515_v36 = vadd.f32 %v1326_v32, %v2026_v25  ;;  %v506_v37 = vpop.f32.mrb[3].mxu0  ;;  %v2038_v38 = vadd.f32 %v1342_v34, %v2026_v25  ;;  %v570_v39 = vpop.f32.mrb[3].mxu1  ;;  %v829_v49 = vmul.f32 %v512_v35, %v512_v35 }
 0x179   : > { %v507_v40 = vadd.f32 %v2026_v25, %v506_v37  ;;  %v2042_v41 = vadd.f32 %v2026_v25, %v570_v39  ;;  %v827_v42 = vmul.f32 %v504_v31, %v504_v31 }
 0x17a   : > { %v1196_v43 = vpack.c.bf16 %v515_v36, %v512_v35  ;;  %v1236_v44 = vpack.c.bf16 %v2038_v38, %v2029_v29  ;;  %v830_v57 = vmul.f32 %v515_v36, %v515_v36 }
 0x17b   : > { %v1191_v45 = vpack.c.bf16 %v507_v40, %v504_v31  ;;  %v790_v46 = vadd.f32 %v507_v40, %v504_v31  ;;  %v828_v47 = vmul.f32 %v507_v40, %v507_v40  ;;  %v1231_v48 = vpack.c.bf16 %v2042_v41, %v2033_v33 }
 0x17c   : > { %1268 = vst [vmem:[%s2050_s7 + $0x8] sm:$0xff] %v1196_v43   ;;  %1276 = vst [vmem:[%s2050_s7 + $0x48] sm:$0xff] %v1236_v44  }
 0x17d   : > { %1192 = vst [vmem:[%s2050_s7] sm:$0xff] %v1191_v45   ;;  %v791_v50 = vadd.f32 %v790_v46, %v512_v35  ;;  %v859_v51 = vadd.f32 %v828_v47, %v827_v42  ;;  %v1329_v52 = vpop.f32.mrb[4].mxu0  ;;  %1275 = vst [vmem:[%s2050_s7 + $0x40] sm:$0xff] %v1231_v48   ;;  %v1345_v53 = vpop.f32.mrb[4].mxu1 }
 0x17e   : > { %v519_v54 = vpop.f32.mrb[5].mxu0  ;;  %v2057_v55 = vadd.f32 %v1345_v53, %v2026_v25  ;;  %v583_v56 = vpop.f32.mrb[5].mxu1  ;;  %v528_v63 = vadd.f32 %v1329_v52, %v2026_v25 }
 0x17f   : > { %v860_v58 = vadd.f32 %v859_v51, %v829_v49  ;;  %v520_v59 = vadd.f32 %v2026_v25, %v519_v54  ;;  %v792_v60 = vadd.f32 %v791_v50, %v515_v36  ;;  %v1330_v61 = vpop.f32.mrb[6].mxu0  ;;  %v1346_v62 = vpop.f32.mrb[6].mxu1  ;;  %v2067_v9 = vadd.f32 %v2026_v25, %v583_v56 }
 0x180   : > { %v531_v0 = vadd.f32 %v1330_v61, %v2026_v25  ;;  %v522_v1 = vpop.f32.mrb[7].mxu0  ;;  %v2063_v2 = vadd.f32 %v1346_v62, %v2026_v25  ;;  %v586_v3 = vpop.f32.mrb[7].mxu1  ;;  %v833_v16 = vmul.f32 %v528_v63, %v528_v63 }
 0x181   : > { %v793_v4 = vadd.f32 %v792_v60, %v520_v59  ;;  %v831_v5 = vmul.f32 %v520_v59, %v520_v59  ;;  %v861_v6 = vadd.f32 %v860_v58, %v830_v57  ;;  %v523_v7 = vadd.f32 %v2026_v25, %v522_v1 }
 0x182   : > { %v1206_v8 = vpack.c.bf16 %v531_v0, %v528_v63  ;;  %v1246_v10 = vpack.c.bf16 %v2063_v2, %v2057_v55  ;;  %v2074_v15 = vadd.f32 %v2026_v25, %v586_v3  ;;  %v834_v26 = vmul.f32 %v531_v0, %v531_v0 }
 0x183   : > { %v862_v11 = vadd.f32 %v861_v6, %v831_v5  ;;  %v1201_v12 = vpack.c.bf16 %v523_v7, %v520_v59  ;;  %v794_v13 = vadd.f32 %v793_v4, %v523_v7  ;;  %v832_v14 = vmul.f32 %v523_v7, %v523_v7 }
 0x184   : > { %1270 = vst [vmem:[%s2050_s7 + $0x18] sm:$0xff] %v1206_v8   ;;  %1278 = vst [vmem:[%s2050_s7 + $0x58] sm:$0xff] %v1246_v10   ;;  %v1241_v22 = vpack.c.bf16 %v2074_v15, %v2067_v9 }
 0x185   : > { %1269 = vst [vmem:[%s2050_s7 + $0x10] sm:$0xff] %v1201_v12   ;;  %v795_v17 = vadd.f32 %v794_v13, %v528_v63  ;;  %v863_v18 = vadd.f32 %v862_v11, %v832_v14  ;;  %v1333_v19 = vpop.f32.mrb[8].mxu0  ;;  %v1349_v20 = vpop.f32.mrb[8].mxu1 }
 0x186   : > { %v535_v21 = vpop.f32.mrb[9].mxu0  ;;  %v2080_v23 = vadd.f32 %v1349_v20, %v2026_v25  ;;  %v599_v24 = vpop.f32.mrb[9].mxu1  ;;  %v544_v34 = vadd.f32 %v1333_v19, %v2026_v25  ;;  %1277 = vst [vmem:[%s2050_s7 + $0x50] sm:$0xff] %v1241_v22  }
 0x187   : > { %v864_v27 = vadd.f32 %v863_v18, %v833_v16  ;;  %v536_v28 = vadd.f32 %v2026_v25, %v535_v21  ;;  %v796_v30 = vadd.f32 %v795_v17, %v531_v0  ;;  %v1334_v31 = vpop.f32.mrb[10].mxu0  ;;  %v1350_v32 = vpop.f32.mrb[10].mxu1  ;;  %v2091_v46 = vadd.f32 %v2026_v25, %v599_v24 }
 0x188   : > { %v547_v35 = vadd.f32 %v1334_v31, %v2026_v25  ;;  %v538_v36 = vpop.f32.mrb[11].mxu0  ;;  %v2087_v37 = vadd.f32 %v1350_v32, %v2026_v25  ;;  %v602_v39 = vpop.f32.mrb[11].mxu1  ;;  %v837_v53 = vmul.f32 %v544_v34, %v544_v34 }
 0x189   : > { %v797_v40 = vadd.f32 %v796_v30, %v536_v28  ;;  %v835_v42 = vmul.f32 %v536_v28, %v536_v28  ;;  %v865_v43 = vadd.f32 %v864_v27, %v834_v26  ;;  %v539_v44 = vadd.f32 %v2026_v25, %v538_v36 }
 0x18a   : > { %v1216_v45 = vpack.c.bf16 %v547_v35, %v544_v34  ;;  %v1256_v47 = vpack.c.bf16 %v2087_v37, %v2080_v23  ;;  %v2098_v52 = vadd.f32 %v2026_v25, %v602_v39  ;;  %v838_v63 = vmul.f32 %v547_v35, %v547_v35 }
 0x18b   : > { %v866_v48 = vadd.f32 %v865_v43, %v835_v42  ;;  %v1211_v49 = vpack.c.bf16 %v539_v44, %v536_v28  ;;  %v798_v50 = vadd.f32 %v797_v40, %v539_v44  ;;  %v836_v51 = vmul.f32 %v539_v44, %v539_v44 }
 0x18c   : > { %1272 = vst [vmem:[%s2050_s7 + $0x28] sm:$0xff] %v1216_v45   ;;  %1280 = vst [vmem:[%s2050_s7 + $0x68] sm:$0xff] %v1256_v47   ;;  %v1251_v60 = vpack.c.bf16 %v2098_v52, %v2091_v46 }
 0x18d   : > { %1271 = vst [vmem:[%s2050_s7 + $0x20] sm:$0xff] %v1211_v49   ;;  %v799_v54 = vadd.f32 %v798_v50, %v544_v34  ;;  %v867_v56 = vadd.f32 %v866_v48, %v836_v51  ;;  %v1337_v57 = vpop.f32.mrb[12].mxu0  ;;  %v1353_v58 = vpop.f32.mrb[12].mxu1 }
 0x18e   : > { %v551_v59 = vpop.f32.mrb[13].mxu0  ;;  %v2106_v61 = vadd.f32 %v1353_v58, %v2026_v25  ;;  %v615_v62 = vpop.f32.mrb[13].mxu1  ;;  %v560_v6 = vadd.f32 %v1337_v57, %v2026_v25  ;;  %1279 = vst [vmem:[%s2050_s7 + $0x60] sm:$0xff] %v1251_v60  }
 0x18f   : > { %v868_v0 = vadd.f32 %v867_v56, %v837_v53  ;;  %v552_v1 = vadd.f32 %v2026_v25, %v551_v59  ;;  %v800_v3 = vadd.f32 %v799_v54, %v547_v35  ;;  %v1338_v4 = vpop.f32.mrb[14].mxu0  ;;  %v1354_v5 = vpop.f32.mrb[14].mxu1  ;;  %v2117_v18 = vadd.f32 %v2026_v25, %v615_v62 }
 0x190   : > { %v563_v7 = vadd.f32 %v1338_v4, %v2026_v25  ;;  %v554_v8 = vpop.f32.mrb[15].mxu0  ;;  %v2113_v10 = vadd.f32 %v1354_v5, %v2026_v25  ;;  %v618_v11 = vpop.f32.mrb[15].mxu1  ;;  %v841_v27 = vmul.f32 %v560_v6, %v560_v6  ;;  %v843_v35 = vmul.f32 %v2033_v33, %v2033_v33 }
 0x191   : > { %v801_v12 = vadd.f32 %v800_v3, %v552_v1  ;;  %v839_v13 = vmul.f32 %v552_v1, %v552_v1  ;;  %v869_v14 = vadd.f32 %v868_v0, %v838_v63  ;;  %v555_v16 = vadd.f32 %v2026_v25, %v554_v8 }
 0x192   : > { %v1226_v17 = vpack.c.bf16 %v563_v7, %v560_v6  ;;  %v1266_v19 = vpack.c.bf16 %v2113_v10, %v2106_v61  ;;  %v2125_v26 = vadd.f32 %v2026_v25, %v618_v11  ;;  %v842_v32 = vmul.f32 %v563_v7, %v563_v7 }
 0x193   : > { %v870_v20 = vadd.f32 %v869_v14, %v839_v13  ;;  %v1221_v21 = vpack.c.bf16 %v555_v16, %v552_v1  ;;  %v802_v22 = vadd.f32 %v801_v12, %v555_v16  ;;  %v840_v24 = vmul.f32 %v555_v16, %v555_v16 }
 0x194   : > { %1274 = vst [vmem:[%s2050_s7 + $0x38] sm:$0xff] %v1226_v17   ;;  %1282 = vst [vmem:[%s2050_s7 + $0x78] sm:$0xff] %v1266_v19   ;;  %v1261_v31 = vpack.c.bf16 %v2125_v26, %v2117_v18 }
 0x195   : > { %1273 = vst [vmem:[%s2050_s7 + $0x30] sm:$0xff] %v1221_v21   ;;  %v803_v28 = vadd.f32 %v802_v22, %v560_v6  ;;  %v871_v30 = vadd.f32 %v870_v20, %v840_v24 }
 0x196   : > { %1281 = vst [vmem:[%s2050_s7 + $0x70] sm:$0xff] %v1261_v31  }
 0x197   : > { %v872_v25 = vadd.f32 %v871_v30, %v841_v27  ;;  %v804_v34 = vadd.f32 %v803_v28, %v563_v7 }
 0x199   : > { %v805_v36 = vadd.f32 %v804_v34, %v2033_v33  ;;  %v873_v39 = vadd.f32 %v872_v25, %v842_v32 }
 0x19a   : > { %1589 = shalt.err (!%p1586_p13)
}
 0x19b   : > { %s1590_s7 = scalar_lea.hbm %s2135_s22, 2048  ;;  %s1594_s18 = scalar_lea.hbm %s2354_s1, 8192 }
 0x19c   : > { %p1591_p2 = scmp.ne.s32.totalorder %s2135_s22, %s1590_s7  ;;  %p1595_p10 = scmp.lt.u32.totalorder %s2135_s22, %s2354_s1 }
 0x19d   : > { %p1596_p1 = scmp.lt.u32.totalorder %s1594_s18, %s1590_s7  ;;  %p1598_p9 = scmp.lt.u32.totalorder %s1590_s7, %s2135_s22 }
 0x19e   : > { %p1592_p4 = pnand %p1591_p2, %p1912_p12 }
 0x19f   : > { %p1597_p7 = por %p1596_p1, %p1595_p10 }
 0x1a0   : > { %p1593_p5 = pneg %p1592_p4 }
 0x1a1   : > { %p1599_p11 = por %p1598_p9, %p1597_p7 }
 0x1a3   : > { %p1600_p0 = pnand %p1599_p11, %p1593_p5 }
 0x1a5   : > { %1603 = shalt.err (!%p1600_p0)
}
 0x1a6   : > { %s1742_s6 = smov 64   ;;  %s1743_s11 = smov 4   ;;  %v874_v33 = vadd.f32 %v873_v39, %v843_v35  ;;  %v806_v40 = vadd.f32 %v805_v36, %v2042_v41  ;;  %v844_v42 = vmul.f32 %v2042_v41, %v2042_v41  ;;  %v845_v43 = vmul.f32 %v2029_v29, %v2029_v29 }
 0x1a7   : > { %1377 = dma.vmem_to_hbm [thread:$0]  (%p1912_p12), %s2128_s29, 2048, %s2135_s22, %s900_s28, %s1742_s6, %s1742_s6, %s1743_s11   ;;  %v846_v47 = vmul.f32 %v2038_v38, %v2038_v38  ;;  %v847_v50 = vmul.f32 %v2067_v9, %v2067_v9  ;;  %v848_v56 = vmul.f32 %v2074_v15, %v2074_v15  ;;  %v852_v1 = vmul.f32 %v2098_v52, %v2098_v52 }
 0x1a8   : > { %v807_v44 = vadd.f32 %v806_v40, %v2029_v29  ;;  %v875_v45 = vadd.f32 %v874_v33, %v844_v42  ;;  %v849_v29 = vmul.f32 %v2057_v55, %v2057_v55  ;;  %v857_v12 = vmul.f32 %v2106_v61, %v2106_v61  ;;  %s1150_s8 = sshll.u32 %s2351_s5, 1  ;;  %s2355_s29 = sld [smem:[#allocation21_spill]] }
 0x1a9   : > { %v858_v14 = vmul.f32 %v2113_v10, %v2113_v10  ;;  %s932_s12 = sadd.s32 %s2350_s27, %s1150_s8  ;;  %s939_s28 = sshll.u32 %s2020_s2, 4  ;;  %s2219_s28 = int_to_ptr.vmem [resolvable:$true] %s939_s28 }
 0x1aa   : > { %v876_v48 = vadd.f32 %v875_v45, %v845_v43  ;;  %v808_v49 = vadd.f32 %v807_v44, %v2038_v38  ;;  %v850_v38 = vmul.f32 %v2063_v2, %v2063_v2  ;;  %s1151_s22 = sshll.u32 %s932_s12, 7  ;;  %s2356_s15 = sld [smem:[#allocation27_spill]] }
 0x1ab   : > { %s905_s27 = scalar_lea.sflag [#allocation9], %s262_s9  ;;  %s1604_s21 = scalar_lea.vmem %s2219_s28, 128 }
 0x1ac   : > { %v809_v51 = vadd.f32 %v808_v49, %v2067_v9  ;;  %v877_v53 = vadd.f32 %v876_v48, %v846_v47  ;;  %v851_v9 = vmul.f32 %v2091_v46, %v2091_v46  ;;  %p1605_p12 = scmp.ne.s32.totalorder %s2219_s28, %s1604_s21  ;;  %s1744_s18 = smov [#allocation8]  }
 0x1ad   : > { %s1608_s16 = sshll.u32 %s1744_s18, 4  ;;  %s1609_s16 = int_to_ptr.vmem [resolvable:$false] %s1608_s16 }
 0x1ae   : > { %v878_v54 = vadd.f32 %v877_v53, %v847_v50  ;;  %v810_v41 = vadd.f32 %v809_v51, %v2074_v15  ;;  %p2358_p3 = scmp.ne.s32.totalorder %s2355_s29, 0  ;;  %s1610_s6 = scalar_lea.vmem %s1609_s16, 256 }
 0x1af   : > { %p1611_p13 = scmp.lt.s32.totalorder %s2219_s28, %s1609_s16  ;;  %p1612_p2 = scmp.lt.s32.totalorder %s1610_s6, %s1604_s21 }
 0x1b0   : > { %v811_v57 = vadd.f32 %v810_v41, %v2057_v55  ;;  %v879_v58 = vadd.f32 %v878_v54, %v848_v56  ;;  %v853_v55 = vmul.f32 %v2080_v23, %v2080_v23  ;;  %s2357_s10 = smov %s2356_s15  ;;  %s2217_s5 = scalar_lea.hbm %s2356_s15, %s1151_s22 }
 0x1b1   : > { %p1606_p6 = pnand %p1605_p12, %p2358_p3  ;;  %p1613_p4 = por %p1612_p2, %p1611_p13 }
 0x1b2   : > { %v880_v59 = vadd.f32 %v879_v58, %v849_v29  ;;  %v812_v60 = vadd.f32 %v811_v57, %v2063_v2  ;;  %v854_v2 = vmul.f32 %v2087_v37, %v2087_v37 }
 0x1b3   : > { %p1607_p8 = pneg %p1606_p6 }
 0x1b4   : > { %v813_v62 = vadd.f32 %v812_v60, %v2091_v46  ;;  %v881_v63 = vadd.f32 %v880_v59, %v850_v38  ;;  %v855_v46 = vmul.f32 %v2117_v18, %v2117_v18 }
 0x1b5   : > { %p1614_p5 = pnand %p1613_p4, %p1607_p8 }
 0x1b6   : > { %v882_v0 = vadd.f32 %v881_v63, %v851_v9  ;;  %v814_v15 = vadd.f32 %v813_v62, %v2098_v52 }
 0x1b8   : > { %v815_v3 = vadd.f32 %v814_v15, %v2080_v23  ;;  %v883_v4 = vadd.f32 %v882_v0, %v852_v1  ;;  %v856_v23 = vmul.f32 %v2125_v26, %v2125_v26 }
 0x1ba   : > { %v884_v5 = vadd.f32 %v883_v4, %v853_v55  ;;  %v816_v6 = vadd.f32 %v815_v3, %v2087_v37 }
 0x1bc   : > { %v817_v7 = vadd.f32 %v816_v6, %v2117_v18  ;;  %v885_v8 = vadd.f32 %v884_v5, %v854_v2 }
 0x1be   : > { %v886_v52 = vadd.f32 %v885_v8, %v855_v46  ;;  %v818_v11 = vadd.f32 %v817_v7, %v2125_v26 }
 0x1c0   : > { %v819_v13 = vadd.f32 %v818_v11, %v2106_v61  ;;  %v887_v37 = vadd.f32 %v886_v52, %v856_v23 }
 0x1c2   : > { %v820_v16 = vadd.f32 %v819_v13, %v2113_v10  ;;  %v888_v17 = vadd.f32 %v887_v37, %v857_v12 }
 0x1c4   : > { %v821_v18 = vrot.slane %v820_v16, 4  ;;  %v889_v19 = vadd.f32 %v888_v17, %v858_v14 }
 0x1c6   : > { %v822_v20 = vadd.f32 %v821_v18, %v820_v16  ;;  %v890_v21 = vrot.slane %v889_v19, 4 }
 0x1c8   : > { %v823_v22 = vrot.slane %v822_v20, 2  ;;  %v891_v24 = vadd.f32 %v890_v21, %v889_v19 }
 0x1ca   : > { %v824_v26 = vadd.f32 %v823_v22, %v822_v20  ;;  %v892_v61 = vrot.slane %v891_v24, 2 }
 0x1cc   : > { %v825_v27 = vrot.slane %v824_v26, 1  ;;  %v893_v28 = vadd.f32 %v892_v61, %v891_v24 }
 0x1ce   : > { %v826_v10 = vadd.f32 %v825_v27, %v824_v26  ;;  %v894_v30 = vrot.slane %v893_v28, 1 }
 0x1d0   : > { %v895_v31 = vadd.f32 %v894_v30, %v893_v28  ;;  %896 = vst [vmem:[%s2020_s2] sm:$0x1] %v826_v10 }
 0x1d2   : > { %897 = vst [vmem:[%s2020_s2 + $0x1] sm:$0x1] %v895_v31 }
 0x1d3   : > { %1617 = shalt.err (!%p1614_p5)
}
 0x1d4   : > { %s1618_s30 = scalar_lea.hbm %s2217_s5, 128  ;;  %s1622_s11 = scalar_lea.hbm %s2357_s10, 512 }
 0x1d5   : > { %p1619_p10 = scmp.ne.s32.totalorder %s2217_s5, %s1618_s30  ;;  %p1623_p9 = scmp.lt.u32.totalorder %s2217_s5, %s2357_s10 }
 0x1d6   : > { %p1624_p11 = scmp.lt.u32.totalorder %s1622_s11, %s1618_s30  ;;  %p1626_p12 = scmp.lt.u32.totalorder %s1618_s30, %s2217_s5 }
 0x1d7   : > { %p1620_p1 = pnand %p1619_p10, %p2358_p3 }
 0x1d8   : > { %p1625_p0 = por %p1624_p11, %p1623_p9 }
 0x1d9   : > { %p1621_p7 = pneg %p1620_p1 }
 0x1da   : > { %p1627_p6 = por %p1626_p12, %p1625_p0 }
 0x1dc   : > { %p1628_p8 = pnand %p1627_p6, %p1621_p7 }
 0x1de   : > { %1631 = shalt.err (!%p1628_p8)
}
 0x1df   : > { %1378 = dma.vmem_to_hbm [thread:$0]  (%p2358_p3), %s2219_s28, 128, %s2217_s5, %s905_s27  }
 0x1e0 PF: > { %s2359_s22 = sld [smem:[#allocation16_spill]]  ;;  %s2360_s13 = sld [smem:[#allocation20_spill]] }
 0x1e1   : > { %p1399_p13 = scmp.ge.s32.totalorder %s1734_s25, 2 }
 0x1e6   : > { %s951_s7 = sand.u32 1, %s2359_s22   ;;  %p2361_p2 = scmp.ne.s32.totalorder %s2360_s13, 0 }
 0x1e7   : > { %s952_s15 = scalar_lea.sflag [#allocation4], %s951_s7 }
 0x1e8   : > { %p1390_p4 = pnand %p1399_p13, %p2361_p2 }
 0x1ea   : > { %1685 = dma.done.wait (!%p1390_p4), %s952_s15, 2048  }
 0x1eb   : > { %1687 = vsyncadd (!%p1390_p4), %s952_s15, 4294965248  ;;  %s2362_s21 = sld [smem:[#allocation14_spill]]  ;;  %s2363_s18 = sld [smem:[#allocation22_spill]] }
 0x1f1   : > { %s960_s16 = sand.u32 1, %s2362_s21   ;;  %p2364_p5 = scmp.ne.s32.totalorder %s2363_s18, 0 }
 0x1f2   : > { %s961_s29 = scalar_lea.sflag [#allocation9], %s960_s16 }
 0x1f3   : > { %p1393_p10 = pnand %p1399_p13, %p2364_p5 }
 0x1f5   : > { %1689 = dma.done.wait (!%p1393_p10), %s961_s29, 128  }
 0x1f6   : > { %1691 = vsyncadd (!%p1393_p10), %s961_s29, 4294967168  ;;  %s25_s25 = sadd.s32 1, %s1734_s25   ;;  %s2365_s15 = sld [smem:[#allocation15_spill]] }
 0x1f7   : > { %p22_p3 = scmp.ge.s32.totalorder %s25_s25, 6   ;;  %s2366_s16 = smov %s1702_s17 }
 0x1f8   : > { %s2367_s17 = smov %s1932_s3  ;;  %s2368_s18 = smov %s1710_s19 }
 0x1f9   : > { %s2369_s19 = smov %s1714_s20  ;;  %s2370_s20 = smov %s1927_s4 }
 0x1fa   : > { %s2371_s21 = smov %s1726_s23  ;;  %s2372_s22 = smov %s1730_s24 }
 0x1fb   : > { %s2373_s23 = smov %s2376_s14  ;;  %s2374_s24 = smov %s2380_s26 }
 0x1fc   :  { %24 = sbr.rel (!%p22_p3) target bundleno = 17 (0x11), region = 98 }
 0x203   :  { %966 = vsyncpa [#allocation3], 1 }
 0x204   :  { %968 = vsyncpa [#allocation3 + $0x1], 1 }
 0x205   :  { %969 = vsyncpa [#allocation6], 1 }
 0x206   :  { %970 = vsyncpa [#allocation4], 1 }
 0x207   :  { %972 = vsyncpa [#allocation4 + $0x1], 1 }
 0x208   :  { %973 = vsyncpa [#allocation9], 1 }
 0x209   :  { %975 = vsyncpa [#allocation9 + $0x1], 1 }

</bundles_post_ra>
